<compile_context>
chip_gen: v6e
topology: v6e:2x2x1
jax: 0.10.0
libtpu: 0.0.40
codegen_flags: <defaults>
</compile_context>

<pallas_src>
import jax
import jax.numpy as jnp
from jax.experimental import pallas as pl
from jax.experimental.pallas import tpu as pltpu


def _round_up(n, m):
    return ((n + m - 1) // m) * m


def _legend_mlp_kernel(x1_ref, x2_ref, w1a_ref, w1b_ref, b1_ref, w3_ref,
                       b3_ref, o_ref):
    # x1/x2 : (TB, E2) f32          w1a/w1b : (E2, Hp) bf16
    # b1    : (1, Hp)  f32          w3      : (1, Hp)  f32  (fc3 weight, row)
    # b3    : (1, 1)   f32 (SMEM)   o       : (TB, 1)  f32
    x1 = x1_ref[...].astype(jnp.bfloat16)   # in-kernel cast, hidden under DMA
    x2 = x2_ref[...].astype(jnp.bfloat16)
    h = jnp.dot(x1, w1a_ref[...], preferred_element_type=jnp.float32)
    h = h + jnp.dot(x2, w1b_ref[...], preferred_element_type=jnp.float32)
    h = jnp.maximum(h + b1_ref[...], 0.0)                    # fc1 bias + ReLU
    # Dropout(p=0.2) is identity at inference time.
    # TODO(synk): training-mode dropout (pltpu.prng_random_bits mask) not implemented.
    y = jnp.sum(h * w3_ref[...], axis=-1, keepdims=True) + b3_ref[0, 0]
    sig = pl.reciprocal(1.0 + jnp.exp(-y), approx=True)      # sigmoid (EUP)
    o_ref[...] = sig.astype(o_ref.dtype)


def _pick_batch_tile(B, e2, max_tile=1024, x_vmem_budget=16 << 20):
    """Largest multiple-of-8 row tile within the VMEM budget for the x tiles.

    Also guarantees >= 2 grid steps when B allows it so the "parallel" batch
    axis can feed both v7x TensorCores.
    """
    bytes_per_row = 2 * 2 * e2 * 4                 # x1 + x2, double-buffered f32
    tb = min(max_tile, max(8, (x_vmem_budget // bytes_per_row) // 8 * 8))
    if B <= tb:
        if B >= 16:
            tb = min(tb, _round_up(-(-B // 2), 8))  # split -> >= 2 grid steps
        else:
            tb = B                                  # single full-array block
    return tb


def legend_network_forward(x1, x2, params, *, batch_tile=1024,
                           single_buffer_residents=True):
    """Forward pass of legend_network.

    x1, x2: (B, embed_dim // 2) each (float32)
    params: dict with w1 (E, H), b1 (1, H), w3 (H, 1), b3 (1, 1)
    returns: (B, 1) float32
    """
    B, e2 = x1.shape
    w1, b1, w3, b3 = params["w1"], params["b1"], params["w3"], params["b3"]
    E, H = w1.shape
    assert E == 2 * e2, "embed_dim must equal 2 * (x1 feature dim)"

    # Split fc1 weight so the kernel never needs concatenated activations.
    # One-time O(E*H) work -- independent of batch size.
    w1a, w1b = w1[:e2, :], w1[e2:, :]

    # Zero-pad hidden dim to the 128-lane width (weights only; zero MACs free).
    Hp = max(128, _round_up(H, 128))
    if Hp != H:
        pad = Hp - H
        w1a = jnp.pad(w1a, ((0, 0), (0, pad)))
        w1b = jnp.pad(w1b, ((0, 0), (0, pad)))
        b1 = jnp.pad(b1, ((0, 0), (0, pad)))
        w3 = jnp.pad(w3, ((0, pad), (0, 0)))
    w1a = w1a.astype(jnp.bfloat16)                # small, one-time weight cast
    w1b = w1b.astype(jnp.bfloat16)
    b1 = b1.reshape(1, Hp).astype(jnp.float32)
    w3_row = w3.reshape(1, Hp).astype(jnp.float32)
    b3 = b3.reshape(1, 1).astype(jnp.float32)

    TB = _pick_batch_tile(B, e2, max_tile=batch_tile)
    grid = (pl.cdiv(B, TB),)

    # VMEM footprint estimate (drives vmem_limit_bytes) + scheduler cost hint.
    n_wbuf = 1 if single_buffer_residents else 2
    footprint = (2 * 2 * TB * e2 * 4              # x1/x2 tiles, double buffered
                 + n_wbuf * 2 * e2 * Hp * 2       # w1a/w1b (bf16)
                 + n_wbuf * 2 * Hp * 4            # b1, w3 rows
                 + TB * Hp * 4                    # hidden activations / temps
                 + 2 * TB * 4)                    # output tile, double buffered
    vmem_limit = int(min(100 << 20, max(32 << 20, footprint * 3 // 2 + (2 << 20))))
    cost = pl.CostEstimate(
        flops=int(2 * B * Hp * (E + 1)),
        transcendentals=int(B),
        bytes_accessed=int(B * E * 4 + B * 4 + E * Hp * 2 + 2 * Hp * 4 + 4),
    )

    def resident(shape):
        # Constant-index (VMEM-resident) block; single-buffer when supported.
        if single_buffer_residents:
            return pl.BlockSpec(shape, lambda i: (0, 0),
                                pipeline_mode=pl.Buffered(1))
        return pl.BlockSpec(shape, lambda i: (0, 0))

    return pl.pallas_call(
        _legend_mlp_kernel,
        out_shape=jax.ShapeDtypeStruct((B, 1), jnp.float32),
        grid=grid,
        in_specs=[
            pl.BlockSpec((TB, e2), lambda i: (i, 0)),            # x1 tile (f32)
            pl.BlockSpec((TB, e2), lambda i: (i, 0)),            # x2 tile (f32)
            resident((e2, Hp)),                                  # w1[:E/2]
            resident((e2, Hp)),                                  # w1[E/2:]
            resident((1, Hp)),                                   # b1
            resident((1, Hp)),                                   # w3 row
            pl.BlockSpec(memory_space=pltpu.MemorySpace.SMEM),   # b3 scalar
        ],
        out_specs=pl.BlockSpec((TB, 1), lambda i: (i, 0)),
        compiler_params=pltpu.CompilerParams(
            dimension_semantics=("parallel",),
            vmem_limit_bytes=vmem_limit),
        cost_estimate=cost,
    )(x1, x2, w1a, w1b, b1, w3_row, b3)


def legend_network(x1, x2, params, *, batch_tile=1024):
    """Entry point: prefers single-buffered resident weights, falls back if the
    installed JAX does not support BlockSpec(pipeline_mode=pl.Buffered(1))."""
    try:
        return legend_network_forward(x1, x2, params, batch_tile=batch_tile,
                                      single_buffer_residents=True)
    except Exception:
        return legend_network_forward(x1, x2, params, batch_tile=batch_tile,
                                      single_buffer_residents=False)


def legend_network_reference(x1, x2, params):
    """Pure-JAX f32 reference matching the PyTorch module (eval mode)."""
    x = jnp.concatenate([x1, x2], axis=1)
    h = jnp.maximum(x @ params["w1"] + params["b1"], 0.0)
    y = h @ params["w3"] + params["b3"]
    return jax.nn.sigmoid(y)


def init_params(key, embed_dim):
    """Deterministic synthetic init matching nn.Linear shapes.

    fc1: Linear(embed_dim, embed_dim // 2)  -> w1 (E, H), b1 (1, H)
    fc3: Linear(embed_dim // 2, 1)          -> w3 (H, 1), b3 (1, 1)
    """
    hidden = embed_dim // 2
    k1, k2, k3, k4 = jax.random.split(key, 4)
    bound1 = 1.0 / jnp.sqrt(embed_dim)
    bound3 = 1.0 / jnp.sqrt(hidden)
    return {
        "w1": jax.random.uniform(k1, (embed_dim, hidden), jnp.float32, -bound1, bound1),
        "b1": jax.random.uniform(k2, (1, hidden), jnp.float32, -bound1, bound1),
        "w3": jax.random.uniform(k3, (hidden, 1), jnp.float32, -bound3, bound3),
        "b3": jax.random.uniform(k4, (1, 1), jnp.float32, -bound3, bound3),
    }


if __name__ == "__main__":
    key = jax.random.PRNGKey(0)
    kx1, kx2, kp = jax.random.split(key, 3)

    embed_dim = 32                       # cat(x1, x2) has embed_dim features
    half = embed_dim // 2
    params = init_params(kp, embed_dim)

    # Case 1: small batch -> single full-array tile.
    b_small = 8
    x1 = jax.random.normal(kx1, (b_small, half), jnp.float32)
    x2 = jax.random.normal(kx2, (b_small, half), jnp.float32)
    out = legend_network(x1, x2, params)
    jax.block_until_ready(out)
    ref = legend_network_reference(x1, x2, params)
    assert out.shape == (b_small, 1)
    err = float(jnp.max(jnp.abs(out - ref)))
    assert err < 3e-2, f"small-batch max abs error {err} vs reference"

    # Case 2: batch not divisible by the tile -> exercises the masked ragged
    # tail and the >= 2-step grid that feeds both v7x TensorCores.
    b_big = 300
    x1b = jax.random.normal(kx1, (b_big, half), jnp.float32)
    x2b = jax.random.normal(kx2, (b_big, half), jnp.float32)
    outb = legend_network(x1b, x2b, params)
    jax.block_until_ready(outb)
    refb = legend_network_reference(x1b, x2b, params)
    assert outb.shape == (b_big, 1)
    errb = float(jnp.max(jnp.abs(outb - refb)))
    assert errb < 3e-2, f"large-batch max abs error {errb} vs reference"

    print("KERNEL_OK")
</pallas_src>

<mosaic_0001>
module attributes {stable_mosaic.version = 11 : i64} {
  func.func @_legend_mlp_kernel(%arg0: i32, %arg1: memref<8x16xf32, #tpu.memory_space<vmem>>, %arg2: memref<8x16xf32, #tpu.memory_space<vmem>>, %arg3: memref<16x128xbf16, #tpu.memory_space<vmem>>, %arg4: memref<16x128xbf16, #tpu.memory_space<vmem>>, %arg5: memref<1x128xf32, #tpu.memory_space<vmem>>, %arg6: memref<1x128xf32, #tpu.memory_space<vmem>>, %arg7: memref<1x1xf32, #tpu.memory_space<smem>>, %arg8: memref<8x1xf32, #tpu.memory_space<vmem>>) attributes {dimension_semantics = [#tpu.dimension_semantics<parallel>], iteration_bounds = array<i64: 1>, scalar_prefetch = 0 : i64, scratch_operands = 0 : i64, tpu.core_type = #tpu.core_type<tc>, window_params = [{transform_indices = @transform_0, window_bounds = array<i64: 8, 16>}, {transform_indices = @transform_1, window_bounds = array<i64: 8, 16>}, {pipeline_mode = #tpu.pipeline_mode<synchronous>, transform_indices = @transform_2, window_bounds = array<i64: 16, 128>}, {pipeline_mode = #tpu.pipeline_mode<synchronous>, transform_indices = @transform_3, window_bounds = array<i64: 16, 128>}, {pipeline_mode = #tpu.pipeline_mode<synchronous>, transform_indices = @transform_4, window_bounds = array<i64: 1, 128>}, {pipeline_mode = #tpu.pipeline_mode<synchronous>, transform_indices = @transform_5, window_bounds = array<i64: 1, 128>}, {transform_indices = @transform_6, window_bounds = array<i64: 1, 1>}, {transform_indices = @transform_7, window_bounds = array<i64: 8, 1>}]} {
    %c0 = arith.constant 0 : index
    %c0_0 = arith.constant 0 : index
    %0 = vector.load %arg1[%c0, %c0_0] : memref<8x16xf32, #tpu.memory_space<vmem>>, vector<8x16xf32>
    %1 = arith.truncf %0 : vector<8x16xf32> to vector<8x16xbf16>
    %c0_1 = arith.constant 0 : index
    %c0_2 = arith.constant 0 : index
    %2 = vector.load %arg2[%c0_1, %c0_2] : memref<8x16xf32, #tpu.memory_space<vmem>>, vector<8x16xf32>
    %3 = arith.truncf %2 : vector<8x16xf32> to vector<8x16xbf16>
    %c0_3 = arith.constant 0 : index
    %c0_4 = arith.constant 0 : index
    %4 = vector.load %arg3[%c0_3, %c0_4] : memref<16x128xbf16, #tpu.memory_space<vmem>>, vector<16x128xbf16>
    %cst = arith.constant dense<0.000000e+00> : vector<8x128xf32>
    %5 = tpu.matmul %1, %4, %cst {dimension_numbers = #tpu.dot_dimension_numbers<[1], [0], [0], [1], [0, 0, 1, 1], [], []>} : vector<8x16xbf16>, vector<16x128xbf16>, vector<8x128xf32> -> vector<8x128xf32>
    %c0_5 = arith.constant 0 : index
    %c0_6 = arith.constant 0 : index
    %6 = vector.load %arg4[%c0_5, %c0_6] : memref<16x128xbf16, #tpu.memory_space<vmem>>, vector<16x128xbf16>
    %cst_7 = arith.constant dense<0.000000e+00> : vector<8x128xf32>
    %7 = tpu.matmul %3, %6, %cst_7 {dimension_numbers = #tpu.dot_dimension_numbers<[1], [0], [0], [1], [0, 0, 1, 1], [], []>} : vector<8x16xbf16>, vector<16x128xbf16>, vector<8x128xf32> -> vector<8x128xf32>
    %8 = arith.addf %5, %7 : vector<8x128xf32>
    %c0_8 = arith.constant 0 : index
    %c0_9 = arith.constant 0 : index
    %9 = vector.load %arg5[%c0_8, %c0_9] : memref<1x128xf32, #tpu.memory_space<vmem>>, vector<1x128xf32>
    %10 = vector.broadcast %9 : vector<1x128xf32> to vector<8x128xf32>
    %11 = arith.addf %8, %10 : vector<8x128xf32>
    %cst_10 = arith.constant 0.000000e+00 : f32
    %12 = vector.broadcast %cst_10 : f32 to vector<8x128xf32>
    %13 = arith.maximumf %11, %12 : vector<8x128xf32>
    %c0_11 = arith.constant 0 : index
    %c0_12 = arith.constant 0 : index
    %14 = vector.load %arg6[%c0_11, %c0_12] : memref<1x128xf32, #tpu.memory_space<vmem>>, vector<1x128xf32>
    %15 = vector.broadcast %14 : vector<1x128xf32> to vector<8x128xf32>
    %16 = arith.mulf %13, %15 : vector<8x128xf32>
    %cst_13 = arith.constant dense<0.000000e+00> : vector<8xf32>
    %17 = vector.multi_reduction <add>, %16, %cst_13 [1] : vector<8x128xf32> to vector<8xf32>
    %18 = vector.shape_cast %17 : vector<8xf32> to vector<8x1xf32>
    %c0_14 = arith.constant 0 : index
    %c0_15 = arith.constant 0 : index
    %19 = memref.load %arg7[%c0_14, %c0_15] : memref<1x1xf32, #tpu.memory_space<smem>>
    %20 = vector.broadcast %19 : f32 to vector<8x1xf32>
    %21 = arith.addf %18, %20 : vector<8x1xf32>
    %cst_16 = arith.constant 0.000000e+00 : f32
    %22 = vector.broadcast %cst_16 : f32 to vector<8x1xf32>
    %23 = arith.subf %22, %21 : vector<8x1xf32>
    %24 = math.exp %23 : vector<8x1xf32>
    %cst_17 = arith.constant 1.000000e+00 : f32
    %25 = vector.broadcast %cst_17 : f32 to vector<8x1xf32>
    %26 = arith.addf %25, %24 : vector<8x1xf32>
    %27 = tpu.reciprocal %26 {approx = true} : vector<8x1xf32> -> vector<8x1xf32>
    %c0_18 = arith.constant 0 : index
    %c0_19 = arith.constant 0 : index
    %28 = vector.load %arg8[%c0_18, %c0_19] : memref<8x1xf32, #tpu.memory_space<vmem>>, vector<8x1xf32>
    tpu.vector_store %arg8[%c0_18, %c0_19], %27 {strides = array<i32>} : memref<8x1xf32, #tpu.memory_space<vmem>>, vector<8x1xf32>,
    return
  }
  func.func @transform_0(%arg0: i32) -> (i32, i32) {
    %c0_i32 = arith.constant 0 : i32
    %c0_i32_0 = arith.constant 0 : i32
    return %arg0, %c0_i32 : i32, i32
  }
  func.func @transform_1(%arg0: i32) -> (i32, i32) {
    %c0_i32 = arith.constant 0 : i32
    %c0_i32_0 = arith.constant 0 : i32
    return %arg0, %c0_i32 : i32, i32
  }
  func.func @transform_2(%arg0: i32) -> (i32, i32) {
    %c0_i32 = arith.constant 0 : i32
    %c0_i32_0 = arith.constant 0 : i32
    %c0_i32_1 = arith.constant 0 : i32
    return %c0_i32, %c0_i32_0 : i32, i32
  }
  func.func @transform_3(%arg0: i32) -> (i32, i32) {
    %c0_i32 = arith.constant 0 : i32
    %c0_i32_0 = arith.constant 0 : i32
    %c0_i32_1 = arith.constant 0 : i32
    return %c0_i32, %c0_i32_0 : i32, i32
  }
  func.func @transform_4(%arg0: i32) -> (i32, i32) {
    %c0_i32 = arith.constant 0 : i32
    %c0_i32_0 = arith.constant 0 : i32
    %c0_i32_1 = arith.constant 0 : i32
    return %c0_i32, %c0_i32_0 : i32, i32
  }
  func.func @transform_5(%arg0: i32) -> (i32, i32) {
    %c0_i32 = arith.constant 0 : i32
    %c0_i32_0 = arith.constant 0 : i32
    %c0_i32_1 = arith.constant 0 : i32
    return %c0_i32, %c0_i32_0 : i32, i32
  }
  func.func @transform_6(%arg0: i32) -> (i32, i32) {
    %c0_i32 = arith.constant 0 : i32
    %c0_i32_0 = arith.constant 0 : i32
    %c0_i32_1 = arith.constant 0 : i32
    return %c0_i32, %c0_i32_0 : i32, i32
  }
  func.func @transform_7(%arg0: i32) -> (i32, i32) {
    %c0_i32 = arith.constant 0 : i32
    %c0_i32_0 = arith.constant 0 : i32
    return %arg0, %c0_i32 : i32, i32
  }
}

module attributes {stable_mosaic.version = 11 : i64} {
  func.func @_legend_mlp_kernel(%arg0: i32, %arg1: memref<8x16xf32, #tpu.memory_space<vmem>>, %arg2: memref<8x16xf32, #tpu.memory_space<vmem>>, %arg3: memref<16x128xbf16, #tpu.memory_space<vmem>>, %arg4: memref<16x128xbf16, #tpu.memory_space<vmem>>, %arg5: memref<1x128xf32, #tpu.memory_space<vmem>>, %arg6: memref<1x128xf32, #tpu.memory_space<vmem>>, %arg7: memref<1x1xf32, #tpu.memory_space<smem>>, %arg8: memref<8x1xf32, #tpu.memory_space<vmem>>) attributes {dimension_semantics = [#tpu.dimension_semantics<parallel>], iteration_bounds = array<i64: 1>, scalar_prefetch = 0 : i64, scratch_operands = 0 : i64, tpu.core_type = #tpu.core_type<tc>, window_params = [{transform_indices = @transform_0, window_bounds = array<i64: 8, 16>}, {transform_indices = @transform_1, window_bounds = array<i64: 8, 16>}, {pipeline_mode = #tpu.pipeline_mode<synchronous>, transform_indices = @transform_2, window_bounds = array<i64: 16, 128>}, {pipeline_mode = #tpu.pipeline_mode<synchronous>, transform_indices = @transform_3, window_bounds = array<i64: 16, 128>}, {pipeline_mode = #tpu.pipeline_mode<synchronous>, transform_indices = @transform_4, window_bounds = array<i64: 1, 128>}, {pipeline_mode = #tpu.pipeline_mode<synchronous>, transform_indices = @transform_5, window_bounds = array<i64: 1, 128>}, {transform_indices = @transform_6, window_bounds = array<i64: 1, 1>}, {transform_indices = @transform_7, window_bounds = array<i64: 8, 1>}]} {
    %c0 = arith.constant 0 : index
    %c0_0 = arith.constant 0 : index
    %0 = vector.load %arg1[%c0, %c0_0] : memref<8x16xf32, #tpu.memory_space<vmem>>, vector<8x16xf32>
    %1 = arith.truncf %0 : vector<8x16xf32> to vector<8x16xbf16>
    %c0_1 = arith.constant 0 : index
    %c0_2 = arith.constant 0 : index
    %2 = vector.load %arg2[%c0_1, %c0_2] : memref<8x16xf32, #tpu.memory_space<vmem>>, vector<8x16xf32>
    %3 = arith.truncf %2 : vector<8x16xf32> to vector<8x16xbf16>
    %c0_3 = arith.constant 0 : index
    %c0_4 = arith.constant 0 : index
    %4 = vector.load %arg3[%c0_3, %c0_4] : memref<16x128xbf16, #tpu.memory_space<vmem>>, vector<16x128xbf16>
    %cst = arith.constant dense<0.000000e+00> : vector<8x128xf32>
    %5 = tpu.matmul %1, %4, %cst {dimension_numbers = #tpu.dot_dimension_numbers<[1], [0], [0], [1], [0, 0, 1, 1], [], []>} : vector<8x16xbf16>, vector<16x128xbf16>, vector<8x128xf32> -> vector<8x128xf32>
    %c0_5 = arith.constant 0 : index
    %c0_6 = arith.constant 0 : index
    %6 = vector.load %arg4[%c0_5, %c0_6] : memref<16x128xbf16, #tpu.memory_space<vmem>>, vector<16x128xbf16>
    %cst_7 = arith.constant dense<0.000000e+00> : vector<8x128xf32>
    %7 = tpu.matmul %3, %6, %cst_7 {dimension_numbers = #tpu.dot_dimension_numbers<[1], [0], [0], [1], [0, 0, 1, 1], [], []>} : vector<8x16xbf16>, vector<16x128xbf16>, vector<8x128xf32> -> vector<8x128xf32>
    %8 = arith.addf %5, %7 : vector<8x128xf32>
    %c0_8 = arith.constant 0 : index
    %c0_9 = arith.constant 0 : index
    %9 = vector.load %arg5[%c0_8, %c0_9] : memref<1x128xf32, #tpu.memory_space<vmem>>, vector<1x128xf32>
    %10 = vector.broadcast %9 : vector<1x128xf32> to vector<8x128xf32>
    %11 = arith.addf %8, %10 : vector<8x128xf32>
    %cst_10 = arith.constant 0.000000e+00 : f32
    %12 = vector.broadcast %cst_10 : f32 to vector<8x128xf32>
    %13 = arith.maximumf %11, %12 : vector<8x128xf32>
    %c0_11 = arith.constant 0 : index
    %c0_12 = arith.constant 0 : index
    %14 = vector.load %arg6[%c0_11, %c0_12] : memref<1x128xf32, #tpu.memory_space<vmem>>, vector<1x128xf32>
    %15 = vector.broadcast %14 : vector<1x128xf32> to vector<8x128xf32>
    %16 = arith.mulf %13, %15 : vector<8x128xf32>
    %cst_13 = arith.constant dense<0.000000e+00> : vector<8xf32>
    %17 = vector.multi_reduction <add>, %16, %cst_13 [1] : vector<8x128xf32> to vector<8xf32>
    %18 = vector.shape_cast %17 : vector<8xf32> to vector<8x1xf32>
    %c0_14 = arith.constant 0 : index
    %c0_15 = arith.constant 0 : index
    %19 = memref.load %arg7[%c0_14, %c0_15] : memref<1x1xf32, #tpu.memory_space<smem>>
    %20 = vector.broadcast %19 : f32 to vector<8x1xf32>
    %21 = arith.addf %18, %20 : vector<8x1xf32>
    %cst_16 = arith.constant 0.000000e+00 : f32
    %22 = vector.broadcast %cst_16 : f32 to vector<8x1xf32>
    %23 = arith.subf %22, %21 : vector<8x1xf32>
    %24 = math.exp %23 : vector<8x1xf32>
    %cst_17 = arith.constant 1.000000e+00 : f32
    %25 = vector.broadcast %cst_17 : f32 to vector<8x1xf32>
    %26 = arith.addf %25, %24 : vector<8x1xf32>
    %27 = tpu.reciprocal %26 {approx = true} : vector<8x1xf32> -> vector<8x1xf32>
    %c0_18 = arith.constant 0 : index
    %c0_19 = arith.constant 0 : index
    %28 = vector.load %arg8[%c0_18, %c0_19] : memref<8x1xf32, #tpu.memory_space<vmem>>, vector<8x1xf32>
    tpu.vector_store %arg8[%c0_18, %c0_19], %27 {strides = array<i32>} : memref<8x1xf32, #tpu.memory_space<vmem>>, vector<8x1xf32>,
    return
  }
  func.func @transform_0(%arg0: i32) -> (i32, i32) {
    %c0_i32 = arith.constant 0 : i32
    %c0_i32_0 = arith.constant 0 : i32
    return %arg0, %c0_i32 : i32, i32
  }
  func.func @transform_1(%arg0: i32) -> (i32, i32) {
    %c0_i32 = arith.constant 0 : i32
    %c0_i32_0 = arith.constant 0 : i32
    return %arg0, %c0_i32 : i32, i32
  }
  func.func @transform_2(%arg0: i32) -> (i32, i32) {
    %c0_i32 = arith.constant 0 : i32
    %c0_i32_0 = arith.constant 0 : i32
    %c0_i32_1 = arith.constant 0 : i32
    return %c0_i32, %c0_i32_0 : i32, i32
  }
  func.func @transform_3(%arg0: i32) -> (i32, i32) {
    %c0_i32 = arith.constant 0 : i32
    %c0_i32_0 = arith.constant 0 : i32
    %c0_i32_1 = arith.constant 0 : i32
    return %c0_i32, %c0_i32_0 : i32, i32
  }
  func.func @transform_4(%arg0: i32) -> (i32, i32) {
    %c0_i32 = arith.constant 0 : i32
    %c0_i32_0 = arith.constant 0 : i32
    %c0_i32_1 = arith.constant 0 : i32
    return %c0_i32, %c0_i32_0 : i32, i32
  }
  func.func @transform_5(%arg0: i32) -> (i32, i32) {
    %c0_i32 = arith.constant 0 : i32
    %c0_i32_0 = arith.constant 0 : i32
    %c0_i32_1 = arith.constant 0 : i32
    return %c0_i32, %c0_i32_0 : i32, i32
  }
  func.func @transform_6(%arg0: i32) -> (i32, i32) {
    %c0_i32 = arith.constant 0 : i32
    %c0_i32_0 = arith.constant 0 : i32
    %c0_i32_1 = arith.constant 0 : i32
    return %c0_i32, %c0_i32_0 : i32, i32
  }
  func.func @transform_7(%arg0: i32) -> (i32, i32) {
    %c0_i32 = arith.constant 0 : i32
    %c0_i32_0 = arith.constant 0 : i32
    return %arg0, %c0_i32 : i32, i32
  }
}

</mosaic_0001>

<bundles_post_ra>
// kernel: tpu_custom_call.1
= control target key start
LH: loop header
LB: loop body
LE: loop exit
PB: predicated region body
PF: predicated region fallthrough
CT: control target
= control target key end

     0   :  { %13 = vsyncpa [#allocation4], 0  ;;  %s416_s0 = inlined_call_operand.hbm [shape: f32[8,16], index: 0, kind: input, shape index: {}]   ;;  %s417_s1 = inlined_call_operand.hbm [shape: f32[8,16], index: 1, kind: input, shape index: {}]   ;;  %s418_s2 = inlined_call_operand.hbm [shape: bf16[16,128], index: 2, kind: input, shape index: {}]   ;;  %s419_s3 = inlined_call_operand.hbm [shape: bf16[16,128], index: 3, kind: input, shape index: {}]   ;;  %s420_s4 = inlined_call_operand.vmem [shape: f32[1,128], index: 4, kind: input, shape index: {}]   ;;  %s421_s5 = inlined_call_operand.vmem [shape: f32[1,128], index: 5, kind: input, shape index: {}]   ;;  %s422_s6 = inlined_call_operand.<no memory space> [shape: f32[1,1], index: 6, kind: input, shape index: {}]   ;;  %s423_s7 = inlined_call_operand.vmem [shape: f32[8,1], index: 7, kind: output, shape index: {}]  }
   0x1   :  { %14 = vsyncpa [#allocation6], 0 }
   0x2   :  { %15 = vsyncpa [#allocation9], 0  ;;  %s344_s24 = smov [#allocation5]   ;;  %s345_s26 = smov [#allocation3]  }
   0x3   :  { %s32_s25 = sshll.u32 %s344_s24, 4  ;;  %s22_s27 = sshll.u32 %s345_s26, 4  ;;  %s33_s25 = int_to_ptr.vmem [resolvable:$true] %s32_s25  ;;  %s23_s27 = int_to_ptr.vmem [resolvable:$true] %s22_s27 }
   0x4   :  { %s266_s28 = scalar_lea.vmem %s33_s25, 128  ;;  %p271_p1 = scmp.lt.s32.totalorder %s33_s25, %s33_s25 }
   0x5   :  { %p267_p0 = scmp.ne.s32.totalorder %s33_s25, %s266_s28  ;;  %p272_p2 = scmp.lt.s32.totalorder %s266_s28, %s266_s28 }
   0x7   :  { %p273_p3 = por %p272_p2, %p271_p1 }
   0x9   :  { %p274_p4 = pnand %p273_p3, %p267_p0 }
   0xb   :  { %277 = shalt.err (!%p274_p4)
}
   0xc   :  { %35 = dma.hbm_to_vmem [thread:$0]  %s417_s1, 128, %s33_s25, [#allocation6]  }
   0xd   :  { %s286_s8 = scalar_lea.vmem %s23_s27, 128  ;;  %p291_p6 = scmp.lt.s32.totalorder %s23_s27, %s23_s27 }
   0xe   :  { %p287_p5 = scmp.ne.s32.totalorder %s23_s27, %s286_s8  ;;  %p292_p7 = scmp.lt.s32.totalorder %s286_s8, %s286_s8 }
  0x10   :  { %p293_p8 = por %p292_p7, %p291_p6 }
  0x12   :  { %p294_p9 = pnand %p293_p8, %p287_p5 }
  0x14   :  { %297 = shalt.err (!%p294_p9)
}
  0x15   :  { %25 = dma.hbm_to_vmem [thread:$0]  %s416_s0, 128, %s23_s27, [#allocation4]  }
  0x16   :  { %s346_s11 = smov [#allocation7]  }
  0x17   :  { %s41_s12 = sshll.u32 %s346_s11, 4  ;;  %s42_s12 = int_to_ptr.vmem [resolvable:$true] %s41_s12 }
  0x18   :  { %s306_s13 = scalar_lea.vmem %s42_s12, 128  ;;  %p311_p11 = scmp.lt.s32.totalorder %s42_s12, %s42_s12 }
  0x19   :  { %p307_p10 = scmp.ne.s32.totalorder %s42_s12, %s306_s13  ;;  %p312_p12 = scmp.lt.s32.totalorder %s306_s13, %s306_s13 }
  0x1b   :  { %p313_p13 = por %p312_p12, %p311_p11 }
  0x1d   :  { %p314_p0 = pnand %p313_p13, %p307_p10 }
  0x1f   :  { %317 = shalt.err (!%p314_p0)
}
  0x20   :  { %s347_s1 = smov 64   ;;  %s348_s14 = smov 4  }
  0x21   :  { %47 = dma.hbm_to_vmem [thread:$0]  %s418_s2, 128, %s42_s12, [#allocation6], %s347_s1, %s347_s1, %s348_s14  }
  0x22   :  { %s349_s17 = smov [#allocation8]  }
  0x23   :  { %s53_s18 = sshll.u32 %s349_s17, 4  ;;  %s54_s18 = int_to_ptr.vmem [resolvable:$true] %s53_s18 }
  0x24   :  { %s326_s0 = scalar_lea.vmem %s54_s18, 128  ;;  %p331_p2 = scmp.lt.s32.totalorder %s54_s18, %s54_s18 }
  0x25   :  { %p327_p1 = scmp.ne.s32.totalorder %s54_s18, %s326_s0  ;;  %p332_p3 = scmp.lt.s32.totalorder %s326_s0, %s326_s0 }
  0x27   :  { %p333_p4 = por %p332_p3, %p331_p2 }
  0x29   :  { %p334_p5 = pnand %p333_p4, %p327_p1 }
  0x2b   :  { %337 = shalt.err (!%p334_p5)
}
  0x2c   :  { %59 = dma.hbm_to_vmem [thread:$0]  %s419_s3, 128, %s54_s18, [#allocation9], %s347_s1, %s347_s1, %s348_s14  }
  0x2d   :  { %338 = dma.done.wait [#allocation4], 128  }
  0x2e   :  { %339 = vsyncadd [#allocation4], 4294967168 }
  0x2f   :  { %340 = dma.done.wait [#allocation6], 256  }
  0x30   :  { %341 = vsyncadd [#allocation6], 4294967040 }
  0x31   :  { %342 = dma.done.wait [#allocation9], 128  }
  0x32   :  { %343 = vsyncadd [#allocation9], 4294967168  ;;  %v350_v0 = vmov 0.0   ;;  %vm351_vm0 = vmmov 0   ;;  %v252_v1 = vld [vmem:[#allocation8] sm:$0xff]   ;;  %v253_v2 = vld [vmem:[#allocation7] sm:$0xff]   ;;  %v206_v21 = vstv %s422_s6 }
  0x33   :  { %232 = vmatprep.subr.bf16.mxu0 %v350_v0  ;;  %238 = vmatprep.subr.bf16.mxu1 %v350_v0  ;;  %v81_v3 = vld [vmem:[#allocation5] sm:$0xff]  ;;  %vm93_vm1 = vcmask 130048   ;;  %v79_v4 = vld [vmem:[#allocation3] sm:$0xff]  ;;  %vm213_vm2 = vcmask 7168  }
  0x34   :  { %234 = vmatprep.mubr.msk.bf16.mxu0 %vm351_vm0, %v350_v0  ;;  %240 = vmatprep.mubr.msk.bf16.mxu1 %vm351_vm0, %v350_v0  ;;  %v82_v5 = vpack.c.bf16 %v81_v3, %v81_v3  ;;  %v80_v6 = vpack.c.bf16 %v79_v4, %v79_v4  ;;  %v226_v9 = vld [vmem:[%s420_s4] ss:$0 sm:$0xff] }
  0x35   :  { %233 = vmatpush3.bf16.msra.mxu0 %v252_v1  ;;  %239 = vmatpush3.bf16.msra.mxu1 %v253_v2  ;;  %v227_v16 = vld [vmem:[%s421_s5] ss:$0 sm:$0xff] }
  0x38   :  { %235 = vmatmul.mubr.msk.bf16.vlgmr.msra.gmra.mxu0 %vm93_vm1, %v82_v5  ;;  %241 = vmatmul.mubr.msk.bf16.vlgmr.msra.gmra.mxu1 %vm93_vm1, %v80_v6 }
  0xf8   :  { %v131_v7 = vpop.f32.mrf.mxu0  ;;  %v180_v8 = vpop.f32.mrf.mxu1 }
  0xf9   :  { %v181_v10 = vadd.f32 %v180_v8, %v131_v7 }
  0xfa   :  { %v236_v11 = vpop.f32.mrf.mxu0  ;;  %v242_v12 = vpop.f32.mrf.mxu1 }
  0xfb   :  { %v193_v14 = vadd.f32 %v226_v9, %v181_v10 }
  0xfc   :  { %v134_v13 = vpop.f32.mrf.mxu0  ;;  %v183_v15 = vpop.f32.mrf.mxu1 }
  0xfd   :  { %v194_v18 = vmax.f32 %v193_v14, 0.0 }
  0xfe   :  { %v237_v17 = vpop.f32.mrf.mxu0  ;;  %v243_v19 = vpop.f32.mrf.mxu1 }
  0xff   :  { %v202_v20 = vmul.f32 %v227_v16, %v194_v18 }
 0x101   :  { %203 = vadd.xlane.f32.xlu0 %v202_v20 }
 0x18a   :  { %v204_v22 = vpop.xlane.xlu0 %203 }
 0x18b   :  { %v207_v23 = vadd.f32 %v206_v21, %v204_v22 }
 0x18d   :  { %v208_v24 = vsub.f32 0.0, %v207_v23 }
 0x18f   :  { %v209_v25 = vmul.f32 1.442695, %v208_v24 }
 0x191   :  { %254 = vpow2.f32 %v209_v25 }
 0x19e   :  { %v255_v26 = vpop.eup %254 }
 0x19f   :  { %v211_v27 = vadd.f32 1.0, %v255_v26 }
 0x1a1   :  { %256 = vrcp.f32 %v211_v27 }
 0x1ae   :  { %v257_v28 = vpop.eup %256 }
 0x1af   :  { %214 = vst.msk [vmem:[%s423_s7] sm:$0xff] %vm213_vm2, %v257_v28 }
 0x1b0   :  { %219 = vsyncpa [#allocation4], 1 }
 0x1b1   :  { %220 = vsyncpa [#allocation6], 1 }
 0x1b2   :  { %221 = vsyncpa [#allocation9], 1 }

// kernel: tpu_custom_call.1
= control target key start
LH: loop header
LB: loop body
LE: loop exit
PB: predicated region body
PF: predicated region fallthrough
CT: control target
= control target key end

     0   :  { %13 = vsyncpa [#allocation4], 0  ;;  %s416_s0 = inlined_call_operand.hbm [shape: f32[8,16], index: 0, kind: input, shape index: {}]   ;;  %s417_s1 = inlined_call_operand.hbm [shape: f32[8,16], index: 1, kind: input, shape index: {}]   ;;  %s418_s2 = inlined_call_operand.hbm [shape: bf16[16,128], index: 2, kind: input, shape index: {}]   ;;  %s419_s3 = inlined_call_operand.hbm [shape: bf16[16,128], index: 3, kind: input, shape index: {}]   ;;  %s420_s4 = inlined_call_operand.vmem [shape: f32[1,128], index: 4, kind: input, shape index: {}]   ;;  %s421_s5 = inlined_call_operand.vmem [shape: f32[1,128], index: 5, kind: input, shape index: {}]   ;;  %s422_s6 = inlined_call_operand.<no memory space> [shape: f32[1,1], index: 6, kind: input, shape index: {}]   ;;  %s423_s7 = inlined_call_operand.vmem [shape: f32[8,1], index: 7, kind: output, shape index: {}]  }
   0x1   :  { %14 = vsyncpa [#allocation6], 0 }
   0x2   :  { %15 = vsyncpa [#allocation9], 0  ;;  %s344_s24 = smov [#allocation5]   ;;  %s345_s26 = smov [#allocation3]  }
   0x3   :  { %s32_s25 = sshll.u32 %s344_s24, 4  ;;  %s22_s27 = sshll.u32 %s345_s26, 4  ;;  %s33_s25 = int_to_ptr.vmem [resolvable:$true] %s32_s25  ;;  %s23_s27 = int_to_ptr.vmem [resolvable:$true] %s22_s27 }
   0x4   :  { %s266_s28 = scalar_lea.vmem %s33_s25, 128  ;;  %p271_p1 = scmp.lt.s32.totalorder %s33_s25, %s33_s25 }
   0x5   :  { %p267_p0 = scmp.ne.s32.totalorder %s33_s25, %s266_s28  ;;  %p272_p2 = scmp.lt.s32.totalorder %s266_s28, %s266_s28 }
   0x7   :  { %p273_p3 = por %p272_p2, %p271_p1 }
   0x9   :  { %p274_p4 = pnand %p273_p3, %p267_p0 }
   0xb   :  { %277 = shalt.err (!%p274_p4)
}
   0xc   :  { %35 = dma.hbm_to_vmem [thread:$0]  %s417_s1, 128, %s33_s25, [#allocation6]  }
   0xd   :  { %s286_s8 = scalar_lea.vmem %s23_s27, 128  ;;  %p291_p6 = scmp.lt.s32.totalorder %s23_s27, %s23_s27 }
   0xe   :  { %p287_p5 = scmp.ne.s32.totalorder %s23_s27, %s286_s8  ;;  %p292_p7 = scmp.lt.s32.totalorder %s286_s8, %s286_s8 }
  0x10   :  { %p293_p8 = por %p292_p7, %p291_p6 }
  0x12   :  { %p294_p9 = pnand %p293_p8, %p287_p5 }
  0x14   :  { %297 = shalt.err (!%p294_p9)
}
  0x15   :  { %25 = dma.hbm_to_vmem [thread:$0]  %s416_s0, 128, %s23_s27, [#allocation4]  }
  0x16   :  { %s346_s11 = smov [#allocation7]  }
  0x17   :  { %s41_s12 = sshll.u32 %s346_s11, 4  ;;  %s42_s12 = int_to_ptr.vmem [resolvable:$true] %s41_s12 }
  0x18   :  { %s306_s13 = scalar_lea.vmem %s42_s12, 128  ;;  %p311_p11 = scmp.lt.s32.totalorder %s42_s12, %s42_s12 }
  0x19   :  { %p307_p10 = scmp.ne.s32.totalorder %s42_s12, %s306_s13  ;;  %p312_p12 = scmp.lt.s32.totalorder %s306_s13, %s306_s13 }
  0x1b   :  { %p313_p13 = por %p312_p12, %p311_p11 }
  0x1d   :  { %p314_p0 = pnand %p313_p13, %p307_p10 }
  0x1f   :  { %317 = shalt.err (!%p314_p0)
}
  0x20   :  { %s347_s1 = smov 64   ;;  %s348_s14 = smov 4  }
  0x21   :  { %47 = dma.hbm_to_vmem [thread:$0]  %s418_s2, 128, %s42_s12, [#allocation6], %s347_s1, %s347_s1, %s348_s14  }
  0x22   :  { %s349_s17 = smov [#allocation8]  }
  0x23   :  { %s53_s18 = sshll.u32 %s349_s17, 4  ;;  %s54_s18 = int_to_ptr.vmem [resolvable:$true] %s53_s18 }
  0x24   :  { %s326_s0 = scalar_lea.vmem %s54_s18, 128  ;;  %p331_p2 = scmp.lt.s32.totalorder %s54_s18, %s54_s18 }
  0x25   :  { %p327_p1 = scmp.ne.s32.totalorder %s54_s18, %s326_s0  ;;  %p332_p3 = scmp.lt.s32.totalorder %s326_s0, %s326_s0 }
  0x27   :  { %p333_p4 = por %p332_p3, %p331_p2 }
  0x29   :  { %p334_p5 = pnand %p333_p4, %p327_p1 }
  0x2b   :  { %337 = shalt.err (!%p334_p5)
}
  0x2c   :  { %59 = dma.hbm_to_vmem [thread:$0]  %s419_s3, 128, %s54_s18, [#allocation9], %s347_s1, %s347_s1, %s348_s14  }
  0x2d   :  { %338 = dma.done.wait [#allocation4], 128  }
  0x2e   :  { %339 = vsyncadd [#allocation4], 4294967168 }
  0x2f   :  { %340 = dma.done.wait [#allocation6], 256  }
  0x30   :  { %341 = vsyncadd [#allocation6], 4294967040 }
  0x31   :  { %342 = dma.done.wait [#allocation9], 128  }
  0x32   :  { %343 = vsyncadd [#allocation9], 4294967168  ;;  %v350_v0 = vmov 0.0   ;;  %vm351_vm0 = vmmov 0   ;;  %v252_v1 = vld [vmem:[#allocation8] sm:$0xff]   ;;  %v253_v2 = vld [vmem:[#allocation7] sm:$0xff]   ;;  %v206_v21 = vstv %s422_s6 }
  0x33   :  { %232 = vmatprep.subr.bf16.mxu0 %v350_v0  ;;  %238 = vmatprep.subr.bf16.mxu1 %v350_v0  ;;  %v81_v3 = vld [vmem:[#allocation5] sm:$0xff]  ;;  %vm93_vm1 = vcmask 130048   ;;  %v79_v4 = vld [vmem:[#allocation3] sm:$0xff]  ;;  %vm213_vm2 = vcmask 7168  }
  0x34   :  { %234 = vmatprep.mubr.msk.bf16.mxu0 %vm351_vm0, %v350_v0  ;;  %240 = vmatprep.mubr.msk.bf16.mxu1 %vm351_vm0, %v350_v0  ;;  %v82_v5 = vpack.c.bf16 %v81_v3, %v81_v3  ;;  %v80_v6 = vpack.c.bf16 %v79_v4, %v79_v4  ;;  %v226_v9 = vld [vmem:[%s420_s4] ss:$0 sm:$0xff] }
  0x35   :  { %233 = vmatpush3.bf16.msra.mxu0 %v252_v1  ;;  %239 = vmatpush3.bf16.msra.mxu1 %v253_v2  ;;  %v227_v16 = vld [vmem:[%s421_s5] ss:$0 sm:$0xff] }
  0x38   :  { %235 = vmatmul.mubr.msk.bf16.vlgmr.msra.gmra.mxu0 %vm93_vm1, %v82_v5  ;;  %241 = vmatmul.mubr.msk.bf16.vlgmr.msra.gmra.mxu1 %vm93_vm1, %v80_v6 }
  0xf8   :  { %v131_v7 = vpop.f32.mrf.mxu0  ;;  %v180_v8 = vpop.f32.mrf.mxu1 }
  0xf9   :  { %v181_v10 = vadd.f32 %v180_v8, %v131_v7 }
  0xfa   :  { %v236_v11 = vpop.f32.mrf.mxu0  ;;  %v242_v12 = vpop.f32.mrf.mxu1 }
  0xfb   :  { %v193_v14 = vadd.f32 %v226_v9, %v181_v10 }
  0xfc   :  { %v134_v13 = vpop.f32.mrf.mxu0  ;;  %v183_v15 = vpop.f32.mrf.mxu1 }
  0xfd   :  { %v194_v18 = vmax.f32 %v193_v14, 0.0 }
  0xfe   :  { %v237_v17 = vpop.f32.mrf.mxu0  ;;  %v243_v19 = vpop.f32.mrf.mxu1 }
  0xff   :  { %v202_v20 = vmul.f32 %v227_v16, %v194_v18 }
 0x101   :  { %203 = vadd.xlane.f32.xlu0 %v202_v20 }
 0x18a   :  { %v204_v22 = vpop.xlane.xlu0 %203 }
 0x18b   :  { %v207_v23 = vadd.f32 %v206_v21, %v204_v22 }
 0x18d   :  { %v208_v24 = vsub.f32 0.0, %v207_v23 }
 0x18f   :  { %v209_v25 = vmul.f32 1.442695, %v208_v24 }
 0x191   :  { %254 = vpow2.f32 %v209_v25 }
 0x19e   :  { %v255_v26 = vpop.eup %254 }
 0x19f   :  { %v211_v27 = vadd.f32 1.0, %v255_v26 }
 0x1a1   :  { %256 = vrcp.f32 %v211_v27 }
 0x1ae   :  { %v257_v28 = vpop.eup %256 }
 0x1af   :  { %214 = vst.msk [vmem:[%s423_s7] sm:$0xff] %vm213_vm2, %v257_v28 }
 0x1b0   :  { %219 = vsyncpa [#allocation4], 1 }
 0x1b1   :  { %220 = vsyncpa [#allocation6], 1 }
 0x1b2   :  { %221 = vsyncpa [#allocation9], 1 }

</bundles_post_ra>
